<compile_context>
chip_gen: v7x
topology: tpu7x:2x2x1
jax: 0.10.0
libtpu: 0.0.40
codegen_flags: <defaults>
</compile_context>

<pallas_src>
import functools

import jax
import jax.numpy as jnp
from jax.experimental import pallas as pl
from jax.experimental.pallas import tpu as pltpu


_TAPS = tuple((dy, dx) for dy in (-1, 0, 1) for dx in (-1, 0, 1))  # tap t = (ky*3 + kx)


def _mish(x):
    # x * tanh(softplus(x)) via tanh(log1p(t)) = t*(t+2)/(t*(t+2)+2), t = exp(x).
    # One EUP exp + one EUP reciprocal; exact reciprocal keeps PyTorch-level numerics.
    t = jnp.exp(jnp.minimum(x, 20.0))
    u = t * (t + 2.0)
    return x * u * pl.reciprocal(u + 2.0, approx=False)


def _mish_ref(x):
    # Exact PyTorch semantics (softplus threshold=20) for the pure-JAX reference.
    sp = jnp.where(x > 20.0, x, jnp.log1p(jnp.exp(jnp.minimum(x, 20.0))))
    return x * jnp.tanh(sp)


def _resblock_kernel(x_ref, w1_ref, b1_ref, w3_ref, b3_ref, mask_ref, o_ref,
                     *, img_w, lanes, matmul_dtype):
    x = x_ref[...].astype(jnp.float32)                           # (C, Lb); lanes = Lb

    # ---- Conv 1x1 (BN scale folded into weights) + bias + Mish ------------------
    h = jnp.dot(w1_ref[...].astype(matmul_dtype), x.astype(matmul_dtype),
                preferred_element_type=jnp.float32) + b1_ref[...]
    h = _mish(h)

    # ---- Conv 3x3 (padding=1), accumulated tap-by-tap ----------------------------
    # Each tap is an XLU lane-roll of h; out-of-image (border / image-seam / block-
    # wrap) positions are zeroed by precomputed per-tap masks.  No im2col concat.
    masks = mask_ref[...]                                        # (8, Lb), center dropped
    acc = jnp.dot(w3_ref[4].astype(matmul_dtype), h.astype(matmul_dtype),
                  preferred_element_type=jnp.float32) + b3_ref[...]
    m = 0
    for t, (dy, dx) in enumerate(_TAPS):
        if dy == 0 and dx == 0:
            continue                                             # center tap handled above
        off = dy * img_w + dx
        tap = pltpu.roll(h, shift=(-off) % lanes, axis=1) * masks[m:m + 1, :]
        acc = acc + jnp.dot(w3_ref[t].astype(matmul_dtype), tap.astype(matmul_dtype),
                            preferred_element_type=jnp.float32)
        m += 1

    # ---- residual add + Mish ------------------------------------------------------
    o_ref[...] = _mish(x + acc).astype(o_ref.dtype)


def _pick_splits(n, hw):
    """One grid step on single-TensorCore chips; two whole-image blocks on v7x."""
    try:
        kind = jax.devices()[0].device_kind.lower()
    except Exception:
        return 1
    two_tc = ("v7" in kind) or ("7x" in kind)
    if two_tc and n % 2 == 0 and ((n // 2) * hw) % 128 == 0:
        return 2
    return 1


@functools.partial(jax.jit, static_argnames=("height", "width", "matmul_dtype"))
def resblock(x_nchw, w1s, b1, w3s, b3, masks_img, *, height, width,
             matmul_dtype=jnp.float32):
    n, c = x_nchw.shape[0], x_nchw.shape[1]
    hw = height * width
    total = n * hw
    splits = _pick_splits(n, hw)                     # resolved at trace time
    lanes = total // splits                          # whole images per block

    # (N,C,H,W) -> (C, N*H*W): channels on sublanes, batch*spatial lane-dense.
    x_flat = x_nchw.reshape(n, c, hw).transpose(1, 0, 2).reshape(c, total)
    masks = jnp.tile(masks_img, (1, n))              # (8, N*HW), per-image pattern

    kernel = functools.partial(_resblock_kernel, img_w=width, lanes=lanes,
                               matmul_dtype=matmul_dtype)
    out_flat = pl.pallas_call(
        kernel,
        out_shape=jax.ShapeDtypeStruct((c, total), x_nchw.dtype),
        grid_spec=pltpu.PrefetchScalarGridSpec(
            num_scalar_prefetch=0,
            grid=(splits,),                                      # 1 step (v5e/v6e), 2 (v7x)
            in_specs=[
                pl.BlockSpec((c, lanes), lambda i: (0, i)),      # x  (C sublanes, lanes dense)
                pl.BlockSpec((c, c), lambda i: (0, 0)),          # w1 (BN-scale folded)
                pl.BlockSpec((c, 1), lambda i: (0, 0)),          # b1
                pl.BlockSpec((9, c, c), lambda i: (0, 0, 0)),    # w3 (BN-scale folded, per tap)
                pl.BlockSpec((c, 1), lambda i: (0, 0)),          # b3
                pl.BlockSpec((8, lanes), lambda i: (0, i)),      # per-tap validity masks
            ],
            out_specs=pl.BlockSpec((c, lanes), lambda i: (0, i)),
        ),
        compiler_params=pltpu.CompilerParams(dimension_semantics=("parallel",)),
    )(x_flat, w1s, b1, w3s, b3, masks)
    return (out_flat.reshape(c, n, hw).transpose(1, 0, 2)
            .reshape(n, c, height, width))


def fold_params(w1_oihw, scale1, bias1, w3_oihw, scale3, bias3):
    """Fold BN scales into conv weights; w3 arranged as (9, Cout, Cin) per-tap blocks."""
    w1s = scale1[:, None] * w1_oihw[:, :, 0, 0]                  # (Cout, Cin)
    b1 = bias1[:, None]                                          # (C, 1)
    w3s = jnp.stack([scale3[:, None] * w3_oihw[:, :, ky, kx]     # tap order: (ky, kx)
                     for ky in range(3) for kx in range(3)], axis=0)   # (9, Cout, Cin)
    b3 = bias3[:, None]                                          # (C, 1)
    return w1s, b1, w3s, b3


def build_tap_masks(height, width):
    """masks[m, p] = 1 if (non-center) tap m of flattened position p is inside the image."""
    p = jnp.arange(height * width, dtype=jnp.int32)
    yy = p // width
    xx = p % width
    rows = []
    for dy in (-1, 0, 1):
        for dx in (-1, 0, 1):
            if dy == 0 and dx == 0:
                continue                                         # center tap is always valid
            valid = ((yy + dy >= 0) & (yy + dy < height) &
                     (xx + dx >= 0) & (xx + dx < width))
            rows.append(valid.astype(jnp.float32))
    return jnp.stack(rows, axis=0)                               # (8, H*W)


def reference_nchw(x, w1_oihw, s1, b1, w3_oihw, s3, b3):
    """Pure-JAX reference of the same folded-BN ResBlock (NCHW)."""
    dn = ('NCHW', 'OIHW', 'NCHW')
    h = jax.lax.conv_general_dilated(x, w1_oihw, (1, 1), 'SAME', dimension_numbers=dn)
    h = _mish_ref(h * s1[None, :, None, None] + b1[None, :, None, None])
    h2 = jax.lax.conv_general_dilated(h, w3_oihw, (1, 1), 'SAME', dimension_numbers=dn)
    h2 = h2 * s3[None, :, None, None] + b3[None, :, None, None]
    return _mish_ref(x + h2)


if __name__ == "__main__":
    N, C, H, W = 2, 4, 16, 16
    eps = 1e-5

    key = jax.random.PRNGKey(0)
    ks = jax.random.split(key, 11)

    # Input in PyTorch NCHW convention.
    x_nchw = jax.random.normal(ks[0], (N, C, H, W), jnp.float32)

    # Conv weights in PyTorch OIHW convention (bias=False).
    w1_oihw = jax.random.normal(ks[1], (C, C, 1, 1), jnp.float32) * 0.5
    w3_oihw = jax.random.normal(ks[2], (C, C, 3, 3), jnp.float32) * 0.2

    # BatchNorm parameters (deterministic, nontrivial), folded in eval mode.
    gamma1 = 1.0 + 0.1 * jax.random.normal(ks[3], (C,), jnp.float32)
    beta1 = 0.1 * jax.random.normal(ks[4], (C,), jnp.float32)
    mean1 = 0.1 * jax.random.normal(ks[5], (C,), jnp.float32)
    var1 = jnp.abs(jax.random.normal(ks[6], (C,), jnp.float32)) + 0.5

    gamma3 = 1.0 + 0.1 * jax.random.normal(ks[7], (C,), jnp.float32)
    beta3 = 0.1 * jax.random.normal(ks[8], (C,), jnp.float32)
    mean3 = 0.1 * jax.random.normal(ks[9], (C,), jnp.float32)
    var3 = jnp.abs(jax.random.normal(ks[10], (C,), jnp.float32)) + 0.5

    scale1 = gamma1 / jnp.sqrt(var1 + eps)
    bias1 = beta1 - mean1 * scale1
    scale3 = gamma3 / jnp.sqrt(var3 + eps)
    bias3 = beta3 - mean3 * scale3

    w1s, b1, w3s, b3 = fold_params(w1_oihw, scale1, bias1, w3_oihw, scale3, bias3)
    masks_img = build_tap_masks(H, W)

    out = resblock(x_nchw, w1s, b1, w3s, b3, masks_img, height=H, width=W)
    out = jax.block_until_ready(out)

    # Sanity check against a pure-JAX reference (tolerance dominated by TPU default
    # matmul/conv precision, not by the Mish formulation, which is exact here).
    ref = reference_nchw(x_nchw, w1_oihw, scale1, bias1, w3_oihw, scale3, bias3)
    assert jnp.allclose(out, ref, atol=2e-2, rtol=2e-2), (
        float(jnp.max(jnp.abs(out - ref))))

    print("KERNEL_OK")
</pallas_src>

<mosaic_0001>
module attributes {stable_mosaic.version = 11 : i64} {
  func.func @_resblock_kernel(%arg0: i32, %arg1: memref<4x512xf32, #tpu.memory_space<vmem>>, %arg2: memref<4x4xf32, #tpu.memory_space<vmem>>, %arg3: memref<4x1xf32, #tpu.memory_space<vmem>>, %arg4: memref<9x4x4xf32, #tpu.memory_space<vmem>>, %arg5: memref<4x1xf32, #tpu.memory_space<vmem>>, %arg6: memref<8x512xf32, #tpu.memory_space<vmem>>, %arg7: memref<4x512xf32, #tpu.memory_space<vmem>>) attributes {dimension_semantics = [#tpu.dimension_semantics<parallel>], iteration_bounds = array<i64: 1>, scalar_prefetch = 0 : i64, scratch_operands = 0 : i64, tpu.core_type = #tpu.core_type<tc>, window_params = [{transform_indices = @transform_0, window_bounds = array<i64: 4, 512>}, {pipeline_mode = #tpu.pipeline_mode<synchronous>, transform_indices = @transform_1, window_bounds = array<i64: 4, 4>}, {pipeline_mode = #tpu.pipeline_mode<synchronous>, transform_indices = @transform_2, window_bounds = array<i64: 4, 1>}, {pipeline_mode = #tpu.pipeline_mode<synchronous>, transform_indices = @transform_3, window_bounds = array<i64: 9, 4, 4>}, {pipeline_mode = #tpu.pipeline_mode<synchronous>, transform_indices = @transform_4, window_bounds = array<i64: 4, 1>}, {transform_indices = @transform_5, window_bounds = array<i64: 8, 512>}, {transform_indices = @transform_6, window_bounds = array<i64: 4, 512>}]} {
    %c0 = arith.constant 0 : index
    %c0_0 = arith.constant 0 : index
    %0 = vector.load %arg1[%c0, %c0_0] : memref<4x512xf32, #tpu.memory_space<vmem>>, vector<4x512xf32>
    %c0_1 = arith.constant 0 : index
    %c0_2 = arith.constant 0 : index
    %1 = vector.load %arg2[%c0_1, %c0_2] : memref<4x4xf32, #tpu.memory_space<vmem>>, vector<4x4xf32>
    %cst = arith.constant dense<0.000000e+00> : vector<4x512xf32>
    %2 = tpu.matmul %1, %0, %cst {dimension_numbers = #tpu.dot_dimension_numbers<[1], [0], [0], [1], [0, 0, 1, 1], [], []>} : vector<4x4xf32>, vector<4x512xf32>, vector<4x512xf32> -> vector<4x512xf32>
    %c0_3 = arith.constant 0 : index
    %c0_4 = arith.constant 0 : index
    %3 = vector.load %arg3[%c0_3, %c0_4] : memref<4x1xf32, #tpu.memory_space<vmem>>, vector<4x1xf32>
    %4 = vector.broadcast %3 : vector<4x1xf32> to vector<4x512xf32>
    %5 = arith.addf %2, %4 : vector<4x512xf32>
    %cst_5 = arith.constant 2.000000e+01 : f32
    %6 = vector.broadcast %cst_5 : f32 to vector<4x512xf32>
    %7 = arith.minimumf %5, %6 : vector<4x512xf32>
    %8 = math.exp %7 : vector<4x512xf32>
    %cst_6 = arith.constant 2.000000e+00 : f32
    %9 = vector.broadcast %cst_6 : f32 to vector<4x512xf32>
    %10 = arith.addf %8, %9 : vector<4x512xf32>
    %11 = arith.mulf %8, %10 : vector<4x512xf32>
    %12 = arith.mulf %5, %11 : vector<4x512xf32>
    %cst_7 = arith.constant 2.000000e+00 : f32
    %13 = vector.broadcast %cst_7 : f32 to vector<4x512xf32>
    %14 = arith.addf %11, %13 : vector<4x512xf32>
    %15 = tpu.reciprocal %14 : vector<4x512xf32> -> vector<4x512xf32>
    %16 = arith.mulf %12, %15 : vector<4x512xf32>
    %c0_8 = arith.constant 0 : index
    %c0_9 = arith.constant 0 : index
    %17 = vector.load %arg6[%c0_8, %c0_9] : memref<8x512xf32, #tpu.memory_space<vmem>>, vector<8x512xf32>
    %c4 = arith.constant 4 : index
    %c0_10 = arith.constant 0 : index
    %c0_11 = arith.constant 0 : index
    %18 = vector.load %arg4[%c4, %c0_10, %c0_11] : memref<9x4x4xf32, #tpu.memory_space<vmem>>, vector<1x4x4xf32>
    %19 = vector.shape_cast %18 : vector<1x4x4xf32> to vector<4x4xf32>
    %cst_12 = arith.constant dense<0.000000e+00> : vector<4x512xf32>
    %20 = tpu.matmul %19, %16, %cst_12 {dimension_numbers = #tpu.dot_dimension_numbers<[1], [0], [0], [1], [0, 0, 1, 1], [], []>} : vector<4x4xf32>, vector<4x512xf32>, vector<4x512xf32> -> vector<4x512xf32>
    %c0_13 = arith.constant 0 : index
    %c0_14 = arith.constant 0 : index
    %21 = vector.load %arg5[%c0_13, %c0_14] : memref<4x1xf32, #tpu.memory_space<vmem>>, vector<4x1xf32>
    %22 = vector.broadcast %21 : vector<4x1xf32> to vector<4x512xf32>
    %23 = arith.addf %20, %22 : vector<4x512xf32>
    %c17_i32 = arith.constant 17 : i32
    %24 = tpu.dynamic_rotate %16 by %c17_i32 dim 1 : vector<4x512xf32>, i32 -> vector<4x512xf32>
    %25 = vector.extract_strided_slice %17 {offsets = [0, 0], sizes = [1, 512], strides = [1, 1]} : vector<8x512xf32> to vector<1x512xf32>
    %26 = vector.broadcast %25 : vector<1x512xf32> to vector<4x512xf32>
    %27 = arith.mulf %24, %26 : vector<4x512xf32>
    %c0_15 = arith.constant 0 : index
    %c0_16 = arith.constant 0 : index
    %c0_17 = arith.constant 0 : index
    %28 = vector.load %arg4[%c0_15, %c0_16, %c0_17] : memref<9x4x4xf32, #tpu.memory_space<vmem>>, vector<1x4x4xf32>
    %29 = vector.shape_cast %28 : vector<1x4x4xf32> to vector<4x4xf32>
    %cst_18 = arith.constant dense<0.000000e+00> : vector<4x512xf32>
    %30 = tpu.matmul %29, %27, %cst_18 {dimension_numbers = #tpu.dot_dimension_numbers<[1], [0], [0], [1], [0, 0, 1, 1], [], []>} : vector<4x4xf32>, vector<4x512xf32>, vector<4x512xf32> -> vector<4x512xf32>
    %31 = arith.addf %23, %30 : vector<4x512xf32>
    %c16_i32 = arith.constant 16 : i32
    %32 = tpu.dynamic_rotate %16 by %c16_i32 dim 1 : vector<4x512xf32>, i32 -> vector<4x512xf32>
    %33 = vector.extract_strided_slice %17 {offsets = [1, 0], sizes = [1, 512], strides = [1, 1]} : vector<8x512xf32> to vector<1x512xf32>
    %34 = vector.broadcast %33 : vector<1x512xf32> to vector<4x512xf32>
    %35 = arith.mulf %32, %34 : vector<4x512xf32>
    %c1 = arith.constant 1 : index
    %c0_19 = arith.constant 0 : index
    %c0_20 = arith.constant 0 : index
    %36 = vector.load %arg4[%c1, %c0_19, %c0_20] : memref<9x4x4xf32, #tpu.memory_space<vmem>>, vector<1x4x4xf32>
    %37 = vector.shape_cast %36 : vector<1x4x4xf32> to vector<4x4xf32>
    %cst_21 = arith.constant dense<0.000000e+00> : vector<4x512xf32>
    %38 = tpu.matmul %37, %35, %cst_21 {dimension_numbers = #tpu.dot_dimension_numbers<[1], [0], [0], [1], [0, 0, 1, 1], [], []>} : vector<4x4xf32>, vector<4x512xf32>, vector<4x512xf32> -> vector<4x512xf32>
    %39 = arith.addf %31, %38 : vector<4x512xf32>
    %c15_i32 = arith.constant 15 : i32
    %40 = tpu.dynamic_rotate %16 by %c15_i32 dim 1 : vector<4x512xf32>, i32 -> vector<4x512xf32>
    %41 = vector.extract_strided_slice %17 {offsets = [2, 0], sizes = [1, 512], strides = [1, 1]} : vector<8x512xf32> to vector<1x512xf32>
    %42 = vector.broadcast %41 : vector<1x512xf32> to vector<4x512xf32>
    %43 = arith.mulf %40, %42 : vector<4x512xf32>
    %c2 = arith.constant 2 : index
    %c0_22 = arith.constant 0 : index
    %c0_23 = arith.constant 0 : index
    %44 = vector.load %arg4[%c2, %c0_22, %c0_23] : memref<9x4x4xf32, #tpu.memory_space<vmem>>, vector<1x4x4xf32>
    %45 = vector.shape_cast %44 : vector<1x4x4xf32> to vector<4x4xf32>
    %cst_24 = arith.constant dense<0.000000e+00> : vector<4x512xf32>
    %46 = tpu.matmul %45, %43, %cst_24 {dimension_numbers = #tpu.dot_dimension_numbers<[1], [0], [0], [1], [0, 0, 1, 1], [], []>} : vector<4x4xf32>, vector<4x512xf32>, vector<4x512xf32> -> vector<4x512xf32>
    %47 = arith.addf %39, %46 : vector<4x512xf32>
    %c1_i32 = arith.constant 1 : i32
    %48 = tpu.dynamic_rotate %16 by %c1_i32 dim 1 : vector<4x512xf32>, i32 -> vector<4x512xf32>
    %49 = vector.extract_strided_slice %17 {offsets = [3, 0], sizes = [1, 512], strides = [1, 1]} : vector<8x512xf32> to vector<1x512xf32>
    %50 = vector.broadcast %49 : vector<1x512xf32> to vector<4x512xf32>
    %51 = arith.mulf %48, %50 : vector<4x512xf32>
    %c3 = arith.constant 3 : index
    %c0_25 = arith.constant 0 : index
    %c0_26 = arith.constant 0 : index
    %52 = vector.load %arg4[%c3, %c0_25, %c0_26] : memref<9x4x4xf32, #tpu.memory_space<vmem>>, vector<1x4x4xf32>
    %53 = vector.shape_cast %52 : vector<1x4x4xf32> to vector<4x4xf32>
    %cst_27 = arith.constant dense<0.000000e+00> : vector<4x512xf32>
    %54 = tpu.matmul %53, %51, %cst_27 {dimension_numbers = #tpu.dot_dimension_numbers<[1], [0], [0], [1], [0, 0, 1, 1], [], []>} : vector<4x4xf32>, vector<4x512xf32>, vector<4x512xf32> -> vector<4x512xf32>
    %55 = arith.addf %47, %54 : vector<4x512xf32>
    %c511_i32 = arith.constant 511 : i32
    %56 = tpu.dynamic_rotate %16 by %c511_i32 dim 1 : vector<4x512xf32>, i32 -> vector<4x512xf32>
    %57 = vector.extract_strided_slice %17 {offsets = [4, 0], sizes = [1, 512], strides = [1, 1]} : vector<8x512xf32> to vector<1x512xf32>
    %58 = vector.broadcast %57 : vector<1x512xf32> to vector<4x512xf32>
    %59 = arith.mulf %56, %58 : vector<4x512xf32>
    %c5 = arith.constant 5 : index
    %c0_28 = arith.constant 0 : index
    %c0_29 = arith.constant 0 : index
    %60 = vector.load %arg4[%c5, %c0_28, %c0_29] : memref<9x4x4xf32, #tpu.memory_space<vmem>>, vector<1x4x4xf32>
    %61 = vector.shape_cast %60 : vector<1x4x4xf32> to vector<4x4xf32>
    %cst_30 = arith.constant dense<0.000000e+00> : vector<4x512xf32>
    %62 = tpu.matmul %61, %59, %cst_30 {dimension_numbers = #tpu.dot_dimension_numbers<[1], [0], [0], [1], [0, 0, 1, 1], [], []>} : vector<4x4xf32>, vector<4x512xf32>, vector<4x512xf32> -> vector<4x512xf32>
    %63 = arith.addf %55, %62 : vector<4x512xf32>
    %c497_i32 = arith.constant 497 : i32
    %64 = tpu.dynamic_rotate %16 by %c497_i32 dim 1 : vector<4x512xf32>, i32 -> vector<4x512xf32>
    %65 = vector.extract_strided_slice %17 {offsets = [5, 0], sizes = [1, 512], strides = [1, 1]} : vector<8x512xf32> to vector<1x512xf32>
    %66 = vector.broadcast %65 : vector<1x512xf32> to vector<4x512xf32>
    %67 = arith.mulf %64, %66 : vector<4x512xf32>
    %c6 = arith.constant 6 : index
    %c0_31 = arith.constant 0 : index
    %c0_32 = arith.constant 0 : index
    %68 = vector.load %arg4[%c6, %c0_31, %c0_32] : memref<9x4x4xf32, #tpu.memory_space<vmem>>, vector<1x4x4xf32>
    %69 = vector.shape_cast %68 : vector<1x4x4xf32> to vector<4x4xf32>
    %cst_33 = arith.constant dense<0.000000e+00> : vector<4x512xf32>
    %70 = tpu.matmul %69, %67, %cst_33 {dimension_numbers = #tpu.dot_dimension_numbers<[1], [0], [0], [1], [0, 0, 1, 1], [], []>} : vector<4x4xf32>, vector<4x512xf32>, vector<4x512xf32> -> vector<4x512xf32>
    %71 = arith.addf %63, %70 : vector<4x512xf32>
    %c496_i32 = arith.constant 496 : i32
    %72 = tpu.dynamic_rotate %16 by %c496_i32 dim 1 : vector<4x512xf32>, i32 -> vector<4x512xf32>
    %73 = vector.extract_strided_slice %17 {offsets = [6, 0], sizes = [1, 512], strides = [1, 1]} : vector<8x512xf32> to vector<1x512xf32>
    %74 = vector.broadcast %73 : vector<1x512xf32> to vector<4x512xf32>
    %75 = arith.mulf %72, %74 : vector<4x512xf32>
    %c7 = arith.constant 7 : index
    %c0_34 = arith.constant 0 : index
    %c0_35 = arith.constant 0 : index
    %76 = vector.load %arg4[%c7, %c0_34, %c0_35] : memref<9x4x4xf32, #tpu.memory_space<vmem>>, vector<1x4x4xf32>
    %77 = vector.shape_cast %76 : vector<1x4x4xf32> to vector<4x4xf32>
    %cst_36 = arith.constant dense<0.000000e+00> : vector<4x512xf32>
    %78 = tpu.matmul %77, %75, %cst_36 {dimension_numbers = #tpu.dot_dimension_numbers<[1], [0], [0], [1], [0, 0, 1, 1], [], []>} : vector<4x4xf32>, vector<4x512xf32>, vector<4x512xf32> -> vector<4x512xf32>
    %79 = arith.addf %71, %78 : vector<4x512xf32>
    %c495_i32 = arith.constant 495 : i32
    %80 = tpu.dynamic_rotate %16 by %c495_i32 dim 1 : vector<4x512xf32>, i32 -> vector<4x512xf32>
    %81 = vector.extract_strided_slice %17 {offsets = [7, 0], sizes = [1, 512], strides = [1, 1]} : vector<8x512xf32> to vector<1x512xf32>
    %82 = vector.broadcast %81 : vector<1x512xf32> to vector<4x512xf32>
    %83 = arith.mulf %80, %82 : vector<4x512xf32>
    %c8 = arith.constant 8 : index
    %c0_37 = arith.constant 0 : index
    %c0_38 = arith.constant 0 : index
    %84 = vector.load %arg4[%c8, %c0_37, %c0_38] : memref<9x4x4xf32, #tpu.memory_space<vmem>>, vector<1x4x4xf32>
    %85 = vector.shape_cast %84 : vector<1x4x4xf32> to vector<4x4xf32>
    %cst_39 = arith.constant dense<0.000000e+00> : vector<4x512xf32>
    %86 = tpu.matmul %85, %83, %cst_39 {dimension_numbers = #tpu.dot_dimension_numbers<[1], [0], [0], [1], [0, 0, 1, 1], [], []>} : vector<4x4xf32>, vector<4x512xf32>, vector<4x512xf32> -> vector<4x512xf32>
    %87 = arith.addf %79, %86 : vector<4x512xf32>
    %88 = arith.addf %0, %87 : vector<4x512xf32>
    %cst_40 = arith.constant 2.000000e+01 : f32
    %89 = vector.broadcast %cst_40 : f32 to vector<4x512xf32>
    %90 = arith.minimumf %88, %89 : vector<4x512xf32>
    %91 = math.exp %90 : vector<4x512xf32>
    %cst_41 = arith.constant 2.000000e+00 : f32
    %92 = vector.broadcast %cst_41 : f32 to vector<4x512xf32>
    %93 = arith.addf %91, %92 : vector<4x512xf32>
    %94 = arith.mulf %91, %93 : vector<4x512xf32>
    %95 = arith.mulf %88, %94 : vector<4x512xf32>
    %cst_42 = arith.constant 2.000000e+00 : f32
    %96 = vector.broadcast %cst_42 : f32 to vector<4x512xf32>
    %97 = arith.addf %94, %96 : vector<4x512xf32>
    %98 = tpu.reciprocal %97 : vector<4x512xf32> -> vector<4x512xf32>
    %99 = arith.mulf %95, %98 : vector<4x512xf32>
    %c0_43 = arith.constant 0 : index
    %c0_44 = arith.constant 0 : index
    %100 = vector.load %arg7[%c0_43, %c0_44] : memref<4x512xf32, #tpu.memory_space<vmem>>, vector<4x512xf32>
    tpu.vector_store %arg7[%c0_43, %c0_44], %99 {strides = array<i32>} : memref<4x512xf32, #tpu.memory_space<vmem>>, vector<4x512xf32>,
    return
  }
  func.func @transform_0(%arg0: i32) -> (i32, i32) {
    %c0_i32 = arith.constant 0 : i32
    %c0_i32_0 = arith.constant 0 : i32
    return %c0_i32, %arg0 : i32, i32
  }
  func.func @transform_1(%arg0: i32) -> (i32, i32) {
    %c0_i32 = arith.constant 0 : i32
    %c0_i32_0 = arith.constant 0 : i32
    %c0_i32_1 = arith.constant 0 : i32
    return %c0_i32, %c0_i32_0 : i32, i32
  }
  func.func @transform_2(%arg0: i32) -> (i32, i32) {
    %c0_i32 = arith.constant 0 : i32
    %c0_i32_0 = arith.constant 0 : i32
    %c0_i32_1 = arith.constant 0 : i32
    return %c0_i32, %c0_i32_0 : i32, i32
  }
  func.func @transform_3(%arg0: i32) -> (i32, i32, i32) {
    %c0_i32 = arith.constant 0 : i32
    %c0_i32_0 = arith.constant 0 : i32
    %c0_i32_1 = arith.constant 0 : i32
    %c0_i32_2 = arith.constant 0 : i32
    return %c0_i32, %c0_i32_0, %c0_i32_1 : i32, i32, i32
  }
  func.func @transform_4(%arg0: i32) -> (i32, i32) {
    %c0_i32 = arith.constant 0 : i32
    %c0_i32_0 = arith.constant 0 : i32
    %c0_i32_1 = arith.constant 0 : i32
    return %c0_i32, %c0_i32_0 : i32, i32
  }
  func.func @transform_5(%arg0: i32) -> (i32, i32) {
    %c0_i32 = arith.constant 0 : i32
    %c0_i32_0 = arith.constant 0 : i32
    return %c0_i32, %arg0 : i32, i32
  }
  func.func @transform_6(%arg0: i32) -> (i32, i32) {
    %c0_i32 = arith.constant 0 : i32
    %c0_i32_0 = arith.constant 0 : i32
    return %c0_i32, %arg0 : i32, i32
  }
}

</mosaic_0001>

<bundles_post_ra>
// kernel: resblock.1
= control target key start
LH: loop header
LB: loop body
LE: loop exit
PB: predicated region body
PF: predicated region fallthrough
CT: control target
= control target key end

     0   :  { %vm40_vm0 = vcmask 1043456   ;;  %v2141_v2 = vmov 0.0   ;;  %v2142_v5 = vmov 0   ;;  %vm36_vm1 = vcmask 31744   ;;  %s2144_s29 = smov 16   ;;  %s2145_s30 = smov 15   ;;  %s2422_s0 = inlined_call_operand.vmem [shape: f32[4,512], index: 0, kind: input, shape index: {}]   ;;  %s2423_s1 = inlined_call_operand.vmem [shape: f32[4,4], index: 1, kind: input, shape index: {}]   ;;  %s2424_s2 = inlined_call_operand.vmem [shape: f32[4,1], index: 2, kind: input, shape index: {}]   ;;  %s2425_s3 = inlined_call_operand.vmem [shape: f32[9,4,4], index: 3, kind: input, shape index: {}]   ;;  %s2426_s4 = inlined_call_operand.vmem [shape: f32[4,1], index: 4, kind: input, shape index: {}]   ;;  %s2427_s5 = inlined_call_operand.vmem [shape: f32[8,512], index: 5, kind: input, shape index: {}]   ;;  %s2428_s6 = inlined_call_operand.vmem [shape: f32[4,512], index: 6, kind: output, shape index: {}]  }
   0x1   :  { %v2189_v0 = vld [vmem:[%s2422_s0] sm:$0xff]  ;;  %v2194_v1 = vld [vmem:[%s2422_s0 + $0x8] sm:$0xff]  ;;  %113 = vmatprep.mubr.f32.mxu0 %v2141_v2  ;;  %184 = vmatprep.mubr.f32.mxu1 %v2141_v2  ;;  %v2005_v53 = vld [vmem:[%s2425_s3 + $0x10] sm:$0xf]  ;;  %s2146_s7 = smov 1   ;;  %s2147_s8 = smov 127   ;;  %v404_v55 = vlaneseq }
   0x2   :  { %v34_v3 = vcombine.high %v2189_v0, %v2189_v0  ;;  %v35_v4 = vcombine.high %v2194_v1, %v2194_v1  ;;  %2113 = vset.pattern.permute.xlu0 %v2142_v5  ;;  %v26_v6 = vld [vmem:[%s2424_s2] sm:$0xf]  ;;  %2114 = vset.pattern.permute.xlu1 %v2142_v5  ;;  %s2148_s9 = smov 113   ;;  %s2149_s10 = smov 112   ;;  %v2245_v60 = vld [vmem:[%s2427_s5 + $0x18] sm:$0xff]  ;;  %v2250_v62 = vld [vmem:[%s2427_s5 + $0x8] sm:$0xff] }
   0x3   :  { %v25_v7 = vld [vmem:[%s2423_s1] sm:$0xf]  ;;  %29 = vperm.xlu0 %2113, %v26_v6   ;;  %s2143_s1 = smov 17   ;;  %s2150_s11 = smov 111   ;;  %v2232_v56 = vshrl.u32 %v404_v55, 7  ;;  %v2234_v57 = vand.u32 127, %v404_v55 }
   0x4   :  { %1999 = vmatprep.subr.msk.mxu0 %vm40_vm0, %v34_v3  ;;  %2002 = vmatprep.subr.msk.mxu1 %vm40_vm0, %v35_v4  ;;  %v233_v54 = vld [vmem:[%s2426_s4] sm:$0xf]  ;;  %v2255_v63 = vld [vmem:[%s2427_s5 + $0x10] sm:$0xff] }
   0x5   :  { %2000 = vmatpush1.msk.msra.mxu0 %vm40_vm0, %v2189_v0  ;;  %2003 = vmatpush1.msk.msra.mxu1 %vm40_vm0, %v2194_v1  ;;  %v413_v58 = vsub.s32 0, %v2232_v56  ;;  %v2240_v59 = vld [vmem:[%s2427_s5] sm:$0xff]  ;;  %vm406_vm2 = vcmp.lt.s32.totalorder %v2234_v57, 17  ;;  %vm601_vm3 = vcmp.lt.s32.totalorder %v2234_v57, 16  ;;  %vm797_vm4 = vcmp.lt.s32.totalorder %v2234_v57, 15 }
   0x6   :  { %2001 = vmatmul.mubr.msk.f32.vlgmr.msra.gmra.mrb[0].mxu0 %vm36_vm1, %v25_v7  ;;  %2004 = vmatmul.mubr.msk.f32.vlgmr.msra.gmra.mrb[0].mxu1 %vm36_vm1, %v25_v7  ;;  %vm993_vm5 = vcmp.lt.s32.totalorder %v2234_v57, 1  ;;  %vm1189_vm6 = vcmp.lt.s32.totalorder %v2234_v57, 127  ;;  %vm1385_vm7 = vcmp.lt.s32.totalorder %v2234_v57, 113  ;;  %vm1581_vm8 = vcmp.lt.s32.totalorder %v2234_v57, 112 }
   0x7   :  { %318 = vmatprep.mubr.f32.mxu0 %v2141_v2  ;;  %389 = vmatprep.mubr.f32.mxu1 %v2141_v2  ;;  %v414_v4 = vrot.slane %v2240_v59, %v413_v58  ;;  %v426_v5 = vrot.slane %v2245_v60, %v413_v58  ;;  %v418_v6 = vrot.slane %v2250_v62, %v413_v58  ;;  %vm1777_vm9 = vcmp.lt.s32.totalorder %v2234_v57, 111 }
   0x8   :  { %v422_v7 = vrot.slane %v2255_v63, %v413_v58 }
  0x82   :  { %v30_v8 = vpop.permute.xlu0 %29 }
  0xd9   :  { %v115_v9 = vpop.f32.mrb[0].mxu0  ;;  %v186_v10 = vpop.f32.mrb[0].mxu1 }
  0xda   :  { %v116_v11 = vadd.f32 %v115_v9, %v30_v8  ;;  %v187_v12 = vadd.f32 %v186_v10, %v30_v8  ;;  %v117_v13 = vpop.f32.mrb[1].mxu0  ;;  %v188_v14 = vpop.f32.mrb[1].mxu1 }
  0xdb   :  { %v118_v15 = vadd.f32 %v117_v13, %v30_v8  ;;  %v189_v16 = vadd.f32 %v188_v14, %v30_v8  ;;  %v608_v8 = vsub.s32 1, %v2232_v56 }
  0xdc   :  { %v191_v17 = vmin.f32 %v116_v11, 20.0  ;;  %v193_v18 = vmin.f32 %v187_v12, 20.0 }
  0xdd   :  { %v192_v19 = vmin.f32 %v118_v15, 20.0  ;;  %v194_v20 = vmin.f32 %v189_v16, 20.0 }
  0xde   :  { %v195_v21 = vmul.f32 1.442695, %v191_v17  ;;  %v199_v22 = vmul.f32 1.442695, %v193_v18 }
  0xdf   :  { %v197_v23 = vmul.f32 1.442695, %v192_v19  ;;  %v201_v24 = vmul.f32 1.442695, %v194_v20  ;;  %v613_v19 = vrot.slane %v2250_v62, %v608_v8  ;;  %v431_v20 = vld [vmem:[%s2425_s3] sm:$0xf] }
  0xe0   :  { %2117 = vpow2.f32 %v195_v21 }
  0xe1   :  { %2119 = vpow2.f32 %v199_v22 }
  0xe2   :  { %2121 = vpow2.f32 %v197_v23 }
  0xe3   :  { %2123 = vpow2.f32 %v201_v24  ;;  %v609_v24 = vrot.slane %v2240_v59, %v608_v8 }
  0xea   :  { %v2118_v25 = vpop.eup %2117 }
  0xeb   :  { %v2120_v26 = vpop.eup %2119  ;;  %v203_v27 = vadd.f32 2.0, %v2118_v25 }
  0xec   :  { %v2122_v28 = vpop.eup %2121  ;;  %v205_v29 = vadd.f32 2.0, %v2120_v26 }
  0xed   :  { %v2124_v30 = vpop.eup %2123  ;;  %v207_v31 = vmul.f32 %v2118_v25, %v203_v27  ;;  %v204_v32 = vadd.f32 2.0, %v2122_v28  ;;  %v621_v27 = vrot.slane %v2245_v60, %v608_v8 }
  0xee   :  { %v209_v33 = vmul.f32 %v2120_v26, %v205_v29  ;;  %v206_v34 = vadd.f32 2.0, %v2124_v30  ;;  %v617_v26 = vrot.slane %v2255_v63, %v608_v8 }
  0xef   :  { %v215_v35 = vadd.f32 2.0, %v207_v31  ;;  %v208_v36 = vmul.f32 %v2122_v28, %v204_v32  ;;  %v211_v41 = vmul.f32 %v207_v31, %v116_v11  ;;  %v804_v28 = vsub.s32 2, %v2232_v56 }
  0xf0   :  { %v217_v37 = vadd.f32 2.0, %v209_v33  ;;  %v210_v38 = vmul.f32 %v2124_v30, %v206_v34  ;;  %v213_v43 = vmul.f32 %v209_v33, %v187_v12 }
  0xf1   :  { %2125 = vrcp.f32 %v215_v35  ;;  %v216_v39 = vadd.f32 2.0, %v208_v36  ;;  %v212_v46 = vmul.f32 %v208_v36, %v118_v15 }
  0xf2   :  { %2127 = vrcp.f32 %v217_v37  ;;  %v218_v40 = vadd.f32 2.0, %v210_v38  ;;  %v214_v49 = vmul.f32 %v210_v38, %v189_v16  ;;  %v809_v37 = vrot.slane %v2250_v62, %v804_v28 }
  0xf3   :  { %2129 = vrcp.f32 %v216_v39  ;;  %v2018_v39 = vld [vmem:[%s2425_s3 + $0x4] sm:$0xf] }
  0xf4   :  { %2131 = vrcp.f32 %v218_v40 }
  0xfb   :  { %v2126_v42 = vpop.eup %2125 }
  0xfc   :  { %v2128_v44 = vpop.eup %2127  ;;  %v223_v45 = vmul.f32 %v2126_v42, %v211_v41  ;;  %v805_v42 = vrot.slane %v2240_v59, %v804_v28 }
  0xfd   :  { %v2130_v47 = vpop.eup %2129  ;;  %v225_v48 = vmul.f32 %v2128_v44, %v213_v43  ;;  %v813_v44 = vrot.slane %v2255_v63, %v804_v28 }
  0xfe   :  { %v2132_v50 = vpop.eup %2131  ;;  %v224_v51 = vmul.f32 %v2130_v47, %v212_v46  ;;  %396 = vrot.lane.b32.xlu0 %v223_v45, %s2143_s1  ;;  %v1000_v46 = vsub.s32 3, %v2232_v56 }
  0xff   :  { %v226_v52 = vmul.f32 %v2132_v50, %v214_v49  ;;  %400 = vrot.lane.b32.xlu1 %v225_v48, %s2143_s1 }
 0x100   :  { %2006 = vmatprep.subr.msk.mxu0 %vm40_vm0, %v224_v51  ;;  %v1005_v55 = vrot.slane %v2250_v62, %v1000_v46  ;;  %v1013_v8 = vrot.slane %v2245_v60, %v1000_v46 }
 0x101   :  { %2009 = vmatprep.subr.msk.mxu1 %vm40_vm0, %v226_v52  ;;  %2007 = vmatpush1.msk.msra.mxu0 %vm40_vm0, %v223_v45 }
 0x102   :  { %2010 = vmatpush1.msk.msra.mxu1 %vm40_vm0, %v225_v48  ;;  %402 = vrot.lane.b32.xlu0 %v226_v52, %s2143_s1 }
 0x103   :  { %398 = vrot.lane.b32.xlu1 %v224_v51, %s2143_s1  ;;  %2008 = vmatmul.mubr.msk.f32.vlgmr.msra.gmra.mrb[2].mxu0 %vm36_vm1, %v2005_v53 }
 0x104   :  { %2011 = vmatmul.mubr.msk.f32.vlgmr.msra.gmra.mrb[2].mxu1 %vm36_vm1, %v2005_v53  ;;  %511 = vmatprep.mubr.f32.mxu0 %v2141_v2 }
 0x105   :  { %582 = vmatprep.mubr.f32.mxu1 %v2141_v2 }
 0x106   :  { %595 = vrot.lane.b32.xlu0 %v224_v51, %s2144_s29 }
 0x107   :  { %593 = vrot.lane.b32.xlu1 %v223_v45, %s2144_s29 }
 0x10a   :  { %599 = vrot.lane.b32.xlu0 %v226_v52, %s2144_s29 }
 0x10b   :  { %597 = vrot.lane.b32.xlu1 %v225_v48, %s2144_s29 }
 0x10e   :  { %791 = vrot.lane.b32.xlu0 %v224_v51, %s2145_s30 }
 0x10f   :  { %789 = vrot.lane.b32.xlu1 %v223_v45, %s2145_s30 }
 0x112   :  { %795 = vrot.lane.b32.xlu0 %v226_v52, %s2145_s30 }
 0x113   :  { %793 = vrot.lane.b32.xlu1 %v225_v48, %s2145_s30 }
 0x116   :  { %987 = vrot.lane.b32.xlu0 %v224_v51, %s2146_s7 }
 0x117   :  { %985 = vrot.lane.b32.xlu1 %v223_v45, %s2146_s7 }
 0x11a   :  { %991 = vrot.lane.b32.xlu0 %v226_v52, %s2146_s7 }
 0x11b   :  { %989 = vrot.lane.b32.xlu1 %v225_v48, %s2146_s7 }
 0x11e   :  { %1183 = vrot.lane.b32.xlu0 %v224_v51, %s2147_s8 }
 0x11f   :  { %1181 = vrot.lane.b32.xlu1 %v223_v45, %s2147_s8 }
 0x122   :  { %1187 = vrot.lane.b32.xlu0 %v226_v52, %s2147_s8 }
 0x123   :  { %1185 = vrot.lane.b32.xlu1 %v225_v48, %s2147_s8 }
 0x126   :  { %1379 = vrot.lane.b32.xlu0 %v224_v51, %s2148_s9 }
 0x127   :  { %1377 = vrot.lane.b32.xlu1 %v223_v45, %s2148_s9 }
 0x12a   :  { %1383 = vrot.lane.b32.xlu0 %v226_v52, %s2148_s9 }
 0x12b   :  { %1381 = vrot.lane.b32.xlu1 %v225_v48, %s2148_s9 }
 0x12e   :  { %1575 = vrot.lane.b32.xlu0 %v224_v51, %s2149_s10 }
 0x12f   :  { %1573 = vrot.lane.b32.xlu1 %v223_v45, %s2149_s10 }
 0x132   :  { %1579 = vrot.lane.b32.xlu0 %v226_v52, %s2149_s10 }
 0x133   :  { %1577 = vrot.lane.b32.xlu1 %v225_v48, %s2149_s10 }
 0x136   :  { %1771 = vrot.lane.b32.xlu0 %v224_v51, %s2150_s11 }
 0x137   :  { %1769 = vrot.lane.b32.xlu1 %v223_v45, %s2150_s11  ;;  %v817_v45 = vrot.slane %v2245_v60, %v804_v28 }
 0x13a   :  { %1775 = vrot.lane.b32.xlu0 %v226_v52, %s2150_s11 }
 0x13b   :  { %1773 = vrot.lane.b32.xlu1 %v225_v48, %s2150_s11 }
 0x13f   :  { %236 = vperm.xlu1 %2114, %v233_v54  }
 0x170   :  { %v397_v61 = vpop.permute.xlu0 %396 }
 0x171   :  { %v401_v3 = vpop.permute.xlu1 %400 }
 0x174   :  { %v403_v9 = vpop.permute.xlu0 %402 }
 0x175   :  { %v399_v10 = vpop.permute.xlu1 %398  ;;  %v407_v11 = vsel %vm406_vm2, %v401_v3, %v403_v9  ;;  %v410_v12 = vsel %vm406_vm2, %v403_v9, %v397_v61 }
 0x176   :  { %v408_v13 = vsel %vm406_vm2, %v399_v10, %v401_v3  ;;  %v409_v14 = vsel %vm406_vm2, %v397_v61, %v399_v10  ;;  %v427_v15 = vmul.f32 %v414_v4, %v410_v12  ;;  %v430_v16 = vmul.f32 %v426_v5, %v407_v11  ;;  %v2025_v61 = vld [vmem:[%s2425_s3 + $0x8] sm:$0xf] }
 0x177   :  { %v428_v17 = vmul.f32 %v418_v6, %v409_v14  ;;  %v429_v18 = vmul.f32 %v422_v7, %v408_v13  ;;  %v1001_v5 = vrot.slane %v2240_v59, %v1000_v46  ;;  %v1009_v7 = vrot.slane %v2255_v63, %v1000_v46 }
 0x178   :  { %2015 = vmatprep.subr.msk.mxu1 %vm40_vm0, %v430_v16  ;;  %v596_v21 = vpop.permute.xlu0 %595 }
 0x179   :  { %v594_v22 = vpop.permute.xlu1 %593  ;;  %2012 = vmatprep.subr.msk.mxu0 %vm40_vm0, %v428_v17  ;;  %2016 = vmatpush1.msk.msra.mxu1 %vm40_vm0, %v429_v18  ;;  %v1196_v17 = vsub.s32 4, %v2232_v56 }
 0x17a   :  { %v604_v23 = vsel %vm601_vm3, %v594_v22, %v596_v21  ;;  %2013 = vmatpush1.msk.msra.mxu0 %vm40_vm0, %v427_v15  ;;  %2017 = vmatmul.mubr.msk.f32.vlgmr.msra.gmra.mrb[2].mxu1 %vm36_vm1, %v431_v20 }
 0x17b   :  { %v623_v25 = vmul.f32 %v613_v19, %v604_v23  ;;  %2014 = vmatmul.mubr.msk.f32.vlgmr.msra.gmra.mrb[2].mxu0 %vm36_vm1, %v431_v20  ;;  %778 = vmatprep.mubr.f32.mxu1 %v2141_v2  ;;  %v2032_v19 = vld [vmem:[%s2425_s3 + $0xc] sm:$0xf]  ;;  %v1205_v23 = vrot.slane %v2255_v63, %v1196_v17 }
 0x17c   :  { %v600_v29 = vpop.permute.xlu0 %599  ;;  %707 = vmatprep.mubr.f32.mxu0 %v2141_v2 }
 0x17d   :  { %v598_v30 = vpop.permute.xlu1 %597  ;;  %v605_v31 = vsel %vm601_vm3, %v600_v29, %v594_v22  ;;  %2019 = vmatprep.subr.msk.mxu0 %vm40_vm0, %v623_v25  ;;  %v1201_v22 = vrot.slane %v2250_v62, %v1196_v17 }
 0x17e   :  { %v603_v32 = vsel %vm601_vm3, %v596_v21, %v598_v30  ;;  %v602_v33 = vsel %vm601_vm3, %v598_v30, %v600_v29  ;;  %v622_v34 = vmul.f32 %v609_v24, %v605_v31  ;;  %v1209_v21 = vrot.slane %v2245_v60, %v1196_v17 }
 0x17f   :  { %v624_v35 = vmul.f32 %v617_v26, %v603_v32  ;;  %v625_v36 = vmul.f32 %v621_v27, %v602_v33  ;;  %v1197_v24 = vrot.slane %v2240_v59, %v1196_v17 }
 0x180   :  { %v792_v38 = vpop.permute.xlu0 %791  ;;  %2020 = vmatpush1.msk.msra.mxu0 %vm40_vm0, %v622_v34 }
 0x181   :  { %v790_v40 = vpop.permute.xlu1 %789  ;;  %2022 = vmatprep.subr.msk.mxu1 %vm40_vm0, %v625_v36 }
 0x182   :  { %v800_v41 = vsel %vm797_vm4, %v790_v40, %v792_v38  ;;  %2023 = vmatpush1.msk.msra.mxu1 %vm40_vm0, %v624_v35  ;;  %v1392_v35 = vsub.s32 5, %v2232_v56 }
 0x183   :  { %v819_v43 = vmul.f32 %v809_v37, %v800_v41  ;;  %2021 = vmatmul.mubr.msk.f32.vlgmr.msra.gmra.mrb[2].mxu0 %vm36_vm1, %v2018_v39  ;;  %2024 = vmatmul.mubr.msk.f32.vlgmr.msra.gmra.mrb[2].mxu1 %vm36_vm1, %v2018_v39  ;;  %v2039_v37 = vld [vmem:[%s2425_s3 + $0x14] sm:$0xf] }
 0x184   :  { %v796_v47 = vpop.permute.xlu0 %795  ;;  %903 = vmatprep.mubr.f32.mxu0 %v2141_v2  ;;  %974 = vmatprep.mubr.f32.mxu1 %v2141_v2  ;;  %v1405_v39 = vrot.slane %v2245_v60, %v1392_v35  ;;  %v1401_v41 = vrot.slane %v2255_v63, %v1392_v35 }
 0x185   :  { %v794_v48 = vpop.permute.xlu1 %793  ;;  %v801_v49 = vsel %vm797_vm4, %v796_v47, %v790_v40  ;;  %2026 = vmatprep.subr.msk.mxu0 %vm40_vm0, %v819_v43  ;;  %v1397_v40 = vrot.slane %v2250_v62, %v1392_v35 }
 0x186   :  { %v799_v50 = vsel %vm797_vm4, %v792_v38, %v794_v48  ;;  %v798_v51 = vsel %vm797_vm4, %v794_v48, %v796_v47  ;;  %v818_v52 = vmul.f32 %v805_v42, %v801_v49  ;;  %v1393_v42 = vrot.slane %v2240_v59, %v1392_v35 }
 0x187   :  { %v820_v53 = vmul.f32 %v813_v44, %v799_v50  ;;  %v821_v54 = vmul.f32 %v817_v45, %v798_v51 }
 0x188   :  { %v988_v58 = vpop.permute.xlu0 %987  ;;  %2027 = vmatpush1.msk.msra.mxu0 %vm40_vm0, %v818_v52 }
 0x189   :  { %v986_v3 = vpop.permute.xlu1 %985  ;;  %2029 = vmatprep.subr.msk.mxu1 %vm40_vm0, %v821_v54 }
 0x18a   :  { %v996_v4 = vsel %vm993_vm5, %v986_v3, %v988_v58  ;;  %2030 = vmatpush1.msk.msra.mxu1 %vm40_vm0, %v820_v53  ;;  %v1588_v53 = vsub.s32 6, %v2232_v56 }
 0x18b   :  { %v1015_v6 = vmul.f32 %v1005_v55, %v996_v4  ;;  %2028 = vmatmul.mubr.msk.f32.vlgmr.msra.gmra.mrb[2].mxu0 %vm36_vm1, %v2025_v61  ;;  %2031 = vmatmul.mubr.msk.f32.vlgmr.msra.gmra.mrb[2].mxu1 %vm36_vm1, %v2025_v61  ;;  %v2046_v55 = vld [vmem:[%s2425_s3 + $0x18] sm:$0xf] }
 0x18c   :  { %v992_v9 = vpop.permute.xlu0 %991  ;;  %1099 = vmatprep.mubr.f32.mxu0 %v2141_v2  ;;  %1170 = vmatprep.mubr.f32.mxu1 %v2141_v2  ;;  %v1601_v61 = vrot.slane %v2245_v60, %v1588_v53  ;;  %v1597_v4 = vrot.slane %v2255_v63, %v1588_v53 }
 0x18d   :  { %v990_v10 = vpop.permute.xlu1 %989  ;;  %v997_v11 = vsel %vm993_vm5, %v992_v9, %v986_v3  ;;  %2033 = vmatprep.subr.msk.mxu0 %vm40_vm0, %v1015_v6  ;;  %v1593_v3 = vrot.slane %v2250_v62, %v1588_v53 }
 0x18e   :  { %v995_v12 = vsel %vm993_vm5, %v988_v58, %v990_v10  ;;  %v994_v13 = vsel %vm993_vm5, %v990_v10, %v992_v9  ;;  %v1014_v14 = vmul.f32 %v1001_v5, %v997_v11  ;;  %v1589_v5 = vrot.slane %v2240_v59, %v1588_v53 }
 0x18f   :  { %v1016_v15 = vmul.f32 %v1009_v7, %v995_v12  ;;  %v1017_v16 = vmul.f32 %v1013_v8, %v994_v13 }
 0x190   :  { %v1184_v18 = vpop.permute.xlu0 %1183  ;;  %2034 = vmatpush1.msk.msra.mxu0 %vm40_vm0, %v1014_v14 }
 0x191   :  { %v1182_v20 = vpop.permute.xlu1 %1181  ;;  %2036 = vmatprep.subr.msk.mxu1 %vm40_vm0, %v1017_v16  ;;  %v1784_v16 = vsub.s32 7, %v2232_v56 }
 0x192   :  { %2037 = vmatpush1.msk.msra.mxu1 %vm40_vm0, %v1016_v15  ;;  %v1192_v26 = vsel %vm1189_vm6, %v1182_v20, %v1184_v18 }
 0x193   :  { %2035 = vmatmul.mubr.msk.f32.vlgmr.msra.gmra.mrb[2].mxu0 %vm36_vm1, %v2032_v19  ;;  %2038 = vmatmul.mubr.msk.f32.vlgmr.msra.gmra.mrb[2].mxu1 %vm36_vm1, %v2032_v19  ;;  %v1210_v34 = vmul.f32 %v1197_v24, %v1192_v26  ;;  %v1789_v56 = vrot.slane %v2250_v62, %v1784_v16 }
 0x194   :  { %v1188_v25 = vpop.permute.xlu0 %1187  ;;  %1295 = vmatprep.mubr.f32.mxu0 %v2141_v2  ;;  %1366 = vmatprep.mubr.f32.mxu1 %v2141_v2 }
 0x195   :  { %v1186_v27 = vpop.permute.xlu1 %1185  ;;  %v1193_v28 = vsel %vm1189_vm6, %v1188_v25, %v1182_v20  ;;  %v1797_v20 = vrot.slane %v2245_v60, %v1784_v16 }
 0x196   :  { %v1191_v29 = vsel %vm1189_vm6, %v1184_v18, %v1186_v27  ;;  %v1190_v30 = vsel %vm1189_vm6, %v1186_v27, %v1188_v25  ;;  %v1213_v31 = vmul.f32 %v1209_v21, %v1193_v28  ;;  %v2053_v18 = vld [vmem:[%s2425_s3 + $0x1c] sm:$0xf]  ;;  %v1793_v21 = vrot.slane %v2255_v63, %v1784_v16 }
 0x197   :  { %v1211_v32 = vmul.f32 %v1201_v22, %v1191_v29  ;;  %v1212_v33 = vmul.f32 %v1205_v23, %v1190_v30  ;;  %v1785_v22 = vrot.slane %v2240_v59, %v1784_v16  ;;  %v2060_v59 = vld [vmem:[%s2425_s3 + $0x20] sm:$0xf] }
 0x198   :  { %2043 = vmatprep.subr.msk.mxu1 %vm40_vm0, %v1213_v31  ;;  %v1380_v36 = vpop.permute.xlu0 %1379 }
 0x199   :  { %v1378_v38 = vpop.permute.xlu1 %1377  ;;  %2040 = vmatprep.subr.msk.mxu0 %vm40_vm0, %v1211_v32  ;;  %2044 = vmatpush1.msk.msra.mxu1 %vm40_vm0, %v1212_v33 }
 0x19a   :  { %2041 = vmatpush1.msk.msra.mxu0 %vm40_vm0, %v1210_v34  ;;  %v1388_v44 = vsel %vm1385_vm7, %v1378_v38, %v1380_v36 }
 0x19b   :  { %2042 = vmatmul.mubr.msk.f32.vlgmr.msra.gmra.mrb[2].mxu0 %vm36_vm1, %v2039_v37  ;;  %2045 = vmatmul.mubr.msk.f32.vlgmr.msra.gmra.mrb[2].mxu1 %vm36_vm1, %v2039_v37  ;;  %v1406_v52 = vmul.f32 %v1393_v42, %v1388_v44 }
 0x19c   :  { %v1384_v43 = vpop.permute.xlu0 %1383  ;;  %1491 = vmatprep.mubr.f32.mxu0 %v2141_v2  ;;  %1562 = vmatprep.mubr.f32.mxu1 %v2141_v2 }
 0x19d   :  { %v1382_v45 = vpop.permute.xlu1 %1381  ;;  %v1389_v46 = vsel %vm1385_vm7, %v1384_v43, %v1378_v38 }
 0x19e   :  { %v1387_v47 = vsel %vm1385_vm7, %v1380_v36, %v1382_v45  ;;  %v1386_v48 = vsel %vm1385_vm7, %v1382_v45, %v1384_v43  ;;  %v1409_v49 = vmul.f32 %v1405_v39, %v1389_v46 }
 0x19f   :  { %v1407_v50 = vmul.f32 %v1397_v40, %v1387_v47  ;;  %v1408_v51 = vmul.f32 %v1401_v41, %v1386_v48 }
 0x1a0   :  { %2050 = vmatprep.subr.msk.mxu1 %vm40_vm0, %v1409_v49  ;;  %v1576_v54 = vpop.permute.xlu0 %1575 }
 0x1a1   :  { %v1574_v58 = vpop.permute.xlu1 %1573  ;;  %2047 = vmatprep.subr.msk.mxu0 %vm40_vm0, %v1407_v50  ;;  %2051 = vmatpush1.msk.msra.mxu1 %vm40_vm0, %v1408_v51 }
 0x1a2   :  { %2048 = vmatpush1.msk.msra.mxu0 %vm40_vm0, %v1406_v52  ;;  %v1584_v7 = vsel %vm1581_vm8, %v1574_v58, %v1576_v54 }
 0x1a3   :  { %2049 = vmatmul.mubr.msk.f32.vlgmr.msra.gmra.mrb[2].mxu0 %vm36_vm1, %v2046_v55  ;;  %2052 = vmatmul.mubr.msk.f32.vlgmr.msra.gmra.mrb[2].mxu1 %vm36_vm1, %v2046_v55  ;;  %v1602_v15 = vmul.f32 %v1589_v5, %v1584_v7 }
 0x1a4   :  { %v1580_v6 = vpop.permute.xlu0 %1579  ;;  %1687 = vmatprep.mubr.f32.mxu0 %v2141_v2  ;;  %1758 = vmatprep.mubr.f32.mxu1 %v2141_v2 }
 0x1a5   :  { %v1578_v8 = vpop.permute.xlu1 %1577  ;;  %v1585_v9 = vsel %vm1581_vm8, %v1580_v6, %v1574_v58 }
 0x1a6   :  { %v1583_v10 = vsel %vm1581_vm8, %v1576_v54, %v1578_v8  ;;  %v1582_v11 = vsel %vm1581_vm8, %v1578_v8, %v1580_v6  ;;  %v1605_v12 = vmul.f32 %v1601_v61, %v1585_v9 }
 0x1a7   :  { %v1603_v13 = vmul.f32 %v1593_v3, %v1583_v10  ;;  %v1604_v14 = vmul.f32 %v1597_v4, %v1582_v11 }
 0x1a8   :  { %2057 = vmatprep.subr.msk.mxu1 %vm40_vm0, %v1605_v12  ;;  %v1772_v17 = vpop.permute.xlu0 %1771 }
 0x1a9   :  { %v1770_v19 = vpop.permute.xlu1 %1769  ;;  %2054 = vmatprep.subr.msk.mxu0 %vm40_vm0, %v1603_v13  ;;  %2058 = vmatpush1.msk.msra.mxu1 %vm40_vm0, %v1604_v14 }
 0x1aa   :  { %2055 = vmatpush1.msk.msra.mxu0 %vm40_vm0, %v1602_v15  ;;  %v1780_v57 = vsel %vm1777_vm9, %v1770_v19, %v1772_v17 }
 0x1ab   :  { %2056 = vmatmul.mubr.msk.f32.vlgmr.msra.gmra.mrb[2].mxu0 %vm36_vm1, %v2053_v18  ;;  %2059 = vmatmul.mubr.msk.f32.vlgmr.msra.gmra.mrb[2].mxu1 %vm36_vm1, %v2053_v18  ;;  %v1798_v30 = vmul.f32 %v1785_v22, %v1780_v57 }
 0x1ac   :  { %v1776_v23 = vpop.permute.xlu0 %1775  ;;  %1883 = vmatprep.mubr.f32.mxu0 %v2141_v2  ;;  %1954 = vmatprep.mubr.f32.mxu1 %v2141_v2 }
 0x1ad   :  { %v1774_v24 = vpop.permute.xlu1 %1773  ;;  %v1781_v25 = vsel %vm1777_vm9, %v1776_v23, %v1770_v19 }
 0x1ae   :  { %v1779_v26 = vsel %vm1777_vm9, %v1772_v17, %v1774_v24  ;;  %v1778_v60 = vsel %vm1777_vm9, %v1774_v24, %v1776_v23  ;;  %v1801_v27 = vmul.f32 %v1797_v20, %v1781_v25 }
 0x1af   :  { %v1799_v28 = vmul.f32 %v1789_v56, %v1779_v26  ;;  %v1800_v29 = vmul.f32 %v1793_v21, %v1778_v60 }
 0x1b0   :  { %2064 = vmatprep.subr.msk.mxu1 %vm40_vm0, %v1801_v27 }
 0x1b1   :  { %2061 = vmatprep.subr.msk.mxu0 %vm40_vm0, %v1799_v28  ;;  %2065 = vmatpush1.msk.msra.mxu1 %vm40_vm0, %v1800_v29 }
 0x1b2   :  { %2062 = vmatpush1.msk.msra.mxu0 %vm40_vm0, %v1798_v30 }
 0x1b3   :  { %2063 = vmatmul.mubr.msk.f32.vlgmr.msra.gmra.mrb[2].mxu0 %vm36_vm1, %v2060_v59  ;;  %2066 = vmatmul.mubr.msk.f32.vlgmr.msra.gmra.mrb[2].mxu1 %vm36_vm1, %v2060_v59 }
 0x1be   :  { %v237_v2 = vpop.permute.xlu1 %236 }
 0x286   :  { %v1885_v62 = vpop.f32.mrb[2].mxu0  ;;  %v1956_v63 = vpop.f32.mrb[2].mxu1 }
 0x287   :  { %v2067_v31 = vadd.f32 %v1885_v62, %v237_v2  ;;  %v2069_v32 = vadd.f32 %v1956_v63, %v237_v2  ;;  %v1887_v33 = vpop.f32.mrb[3].mxu0  ;;  %v1958_v34 = vpop.f32.mrb[3].mxu1 }
 0x288   :  { %v2068_v35 = vadd.f32 %v1887_v33, %v237_v2  ;;  %v2070_v36 = vadd.f32 %v1958_v34, %v237_v2 }
 0x28a   :  { %v1969_v37 = vcombine.low %v2067_v31, %v2068_v35  ;;  %v1970_v38 = vcombine.low %v2069_v32, %v2070_v36 }
 0x28c   :  { %v1973_v39 = vadd.f32 %v1969_v37, %v2189_v0  ;;  %v1974_v40 = vadd.f32 %v1970_v38, %v2194_v1 }
 0x28e   :  { %v1975_v41 = vmin.f32 %v1973_v39, 20.0  ;;  %v1976_v42 = vmin.f32 %v1974_v40, 20.0 }
 0x290   :  { %v1977_v43 = vmul.f32 1.442695, %v1975_v41  ;;  %v1979_v44 = vmul.f32 1.442695, %v1976_v42 }
 0x292   :  { %2133 = vpow2.f32 %v1977_v43 }
 0x293   :  { %2135 = vpow2.f32 %v1979_v44 }
 0x29c   :  { %v2134_v45 = vpop.eup %2133 }
 0x29d   :  { %v2136_v46 = vpop.eup %2135  ;;  %v1981_v47 = vadd.f32 2.0, %v2134_v45 }
 0x29e   :  { %v1982_v48 = vadd.f32 2.0, %v2136_v46 }
 0x29f   :  { %v1983_v49 = vmul.f32 %v2134_v45, %v1981_v47 }
 0x2a0   :  { %v1984_v50 = vmul.f32 %v2136_v46, %v1982_v48 }
 0x2a1   :  { %v1987_v51 = vadd.f32 2.0, %v1983_v49  ;;  %v1985_v53 = vmul.f32 %v1983_v49, %v1973_v39 }
 0x2a2   :  { %v1988_v52 = vadd.f32 2.0, %v1984_v50  ;;  %v1986_v54 = vmul.f32 %v1984_v50, %v1974_v40 }
 0x2a3   :  { %2137 = vrcp.f32 %v1987_v51 }
 0x2a4   :  { %2139 = vrcp.f32 %v1988_v52 }
 0x2ad   :  { %v2138_v0 = vpop.eup %2137 }
 0x2ae   :  { %v2140_v1 = vpop.eup %2139  ;;  %v1991_v55 = vmul.f32 %v2138_v0, %v1985_v53 }
 0x2af   :  { %v1992_v58 = vmul.f32 %v2140_v1, %v1986_v54 }
 0x2b0   :  { %1993 = vst [vmem:[%s2428_s6] sm:$0xff] %v1991_v55 }
 0x2b1   :  { %1994 = vst [vmem:[%s2428_s6 + $0x8] sm:$0xff] %v1992_v58 }

</bundles_post_ra>
